<compile_context>
chip_gen: v7x
topology: tpu7x:2x2x1
jax: 0.10.0
libtpu: 0.0.40
codegen_flags: <defaults>
</compile_context>

<pallas_src>
import functools
import math

import jax
import jax.numpy as jnp
from jax.experimental import pallas as pl
from jax.experimental.pallas import tpu as pltpu


def _drop_path_kernel(scale_ref, x_ref, o_ref, *, tb):
    # scale_ref: VMEM (R_pad, 1), resident per-row scale (0 or 1/keep_prob).
    # x_ref / o_ref: VMEM (tb, tf) lane-dense tiles of the flattened input.
    i = pl.program_id(0)
    s = scale_ref[pl.ds(i * tb, tb), :]           # (tb, 1) slice, always 8-aligned
    o_ref[...] = (x_ref[...] * s).astype(o_ref.dtype)


def _tpu_targets():
    """(target block bytes, vmem_limit_bytes) tuned per TPU generation."""
    try:
        kind = jax.devices()[0].device_kind.lower()
    except Exception:  # defensive: fall back to settings that work everywhere
        kind = ""
    if "v7" in kind:
        # v7x: ~3.2 TB/s HBM (bigger steps amortize per-step overhead) but only
        # 64 MiB physical VMEM -> 4x4 MiB double-buffered footprint, 48 MiB cap.
        return 4 * 1024 * 1024, 48 * 1024 * 1024
    if "v6" in kind:
        # v6e: 128 MiB VMEM; larger blocks buy the last ~1-2% of HBM roofline.
        return 4 * 1024 * 1024, 64 * 1024 * 1024
    # v5e / unknown: 2 MiB blocks already sit at the HBM roofline; explicit
    # 32 MiB scoped limit (v5e default is only 16 MiB) keeps 2x(in+out) safe.
    return 2 * 1024 * 1024, 32 * 1024 * 1024


def _round_down_128(n):
    return (n // 128) * 128


def _choose_tiles(R, F, itemsize, target_bytes):
    """Pick a (tb, tf) block of <= ~target_bytes satisfying the (8, 128) rule."""
    # Lane (feature) tile, capped against the 8-row sublane floor so even the
    # minimum-height block stays within the byte budget.
    tf_cap = max(128, ((target_bytes // (8 * itemsize)) // 128) * 128)
    if F <= tf_cap:
        tf = F                                  # full row (block dim == array dim)
    else:
        tf = max(128, min(_round_down_128(F), tf_cap))  # ragged edge via cdiv
    # Sublane (row) tile: fill the remaining budget; multiple of 8 or == R.
    rows = max(1, target_bytes // max(1, tf * itemsize))
    if rows >= R:
        tb = R
    else:
        tb = min(max(8, (rows // 8) * 8), R)
    return tb, tf


def _choose_fold(B, q, cap_chunks):
    """Largest d | q with d <= cap_chunks and B*(q//d) >= 8 rows; None if no fold."""
    best = None
    for d in range(1, min(q, cap_chunks) + 1):
        if q % d == 0 and B * (q // d) >= 8:
            best = d
    if best is None or q // best < 2:
        return None
    return best


def drop_path(x, drop_prob: float = 0.0, training: bool = False, *, key=None,
              donate: bool = False):
    """Pallas implementation of timm-style drop_path (stochastic depth)."""
    if drop_prob == 0.0 or not training:
        return x
    if not 0.0 < drop_prob < 1.0:
        raise ValueError(f"drop_prob must be in [0, 1), got {drop_prob}")
    if key is None:
        raise ValueError("drop_path in training mode requires a PRNG `key`.")

    keep_prob = 1.0 - drop_prob
    B = x.shape[0]
    F = math.prod(x.shape[1:]) if x.ndim > 1 else 1
    itemsize = jnp.dtype(x.dtype).itemsize
    target_bytes, vmem_limit = _tpu_targets()

    # Per-sample Bernoulli(keep_prob) mask: floor(keep_prob + U[0,1)).
    u = jax.random.uniform(key, (B,), dtype=jnp.float32)
    mask = jnp.floor(jnp.float32(keep_prob) + u)
    # Per-sample scale (0 or 1/keep_prob) in x.dtype -> single native-width
    # VPU multiply in the kernel (no f32 tile promotion for bf16 inputs).
    scale = (mask * jnp.float32(1.0 / keep_prob)).astype(x.dtype)

    # Tiny batch: fold feature chunks into the sublane axis so blocks fill all
    # 8 sublanes of each vreg (a (2, tf) block wastes 3/4 of every vld/vst).
    repeat = 1
    R, Fr = B, F
    if B < 8 and F % 128 == 0 and F >= 256:
        q = F // 128
        cap_chunks = max(1, (target_bytes // (8 * itemsize)) // 128)
        d = _choose_fold(B, q, cap_chunks)
        if d is not None:
            repeat = q // d
            Fr = 128 * d
            R = B * repeat

    x2 = x.reshape(R, Fr)                        # free, contiguous reshape
    tb, tf = _choose_tiles(R, Fr, itemsize, target_bytes)
    grid_b = pl.cdiv(R, tb)
    grid_f = pl.cdiv(Fr, tf)

    # Fully resident per-row scale, zero-padded to the grid-padded row count so
    # the in-kernel dynamic slice never reads past the allocation.
    scale_rows = jnp.repeat(scale, repeat) if repeat > 1 else scale
    r_pad = grid_b * tb
    scale2 = scale_rows.reshape(R, 1)
    if r_pad > R:
        scale2 = jnp.pad(scale2, ((0, r_pad - R), (0, 0)))

    n_bytes = B * F * itemsize
    out2 = pl.pallas_call(
        functools.partial(_drop_path_kernel, tb=tb),
        out_shape=jax.ShapeDtypeStruct((R, Fr), x.dtype),
        grid=(grid_b, grid_f),
        in_specs=[
            pl.BlockSpec((r_pad, 1), lambda i, j: (0, 0)),   # resident scale
            pl.BlockSpec((tb, tf), lambda i, j: (i, j)),     # lane-dense x tile
        ],
        out_specs=pl.BlockSpec((tb, tf), lambda i, j: (i, j)),
        compiler_params=pltpu.CompilerParams(
            dimension_semantics=("parallel", "parallel"),
            vmem_limit_bytes=vmem_limit,
        ),
        cost_estimate=pl.CostEstimate(
            flops=B * F, transcendentals=0,
            bytes_accessed=2 * n_bytes + r_pad * itemsize),
        input_output_aliases=({1: 0} if donate else {}),
    )(scale2, x2)
    return out2.reshape(x.shape)


class DropPath:
    """Drop paths (Stochastic Depth) per sample. No learned parameters."""

    def __init__(self, drop_prob=None):
        self.drop_prob = 0.0 if drop_prob is None else float(drop_prob)
        self.training = True  # mirrors nn.Module default training mode

    def __call__(self, x, key=None):
        return drop_path(x, self.drop_prob, self.training, key=key)


if __name__ == "__main__":
    key = jax.random.PRNGKey(0)
    k_x, k_mask = jax.random.split(key)

    # Small NCHW input consistent with how DropPath is used inside MCCA blocks.
    B, C, H, W = 2, 4, 16, 16
    x = jax.random.normal(k_x, (B, C, H, W), dtype=jnp.float32)

    module = DropPath(drop_prob=0.25)
    module.training = True
    out = jax.block_until_ready(module(x, key=k_mask))
    assert out.shape == x.shape and out.dtype == x.dtype

    # Pure-JAX reference (same mask draw, same scale computation).
    keep_prob = 1.0 - module.drop_prob
    u = jax.random.uniform(k_mask, (B,), dtype=jnp.float32)
    mask = jnp.floor(jnp.float32(keep_prob) + u)
    scale_ref = (mask * jnp.float32(1.0 / keep_prob)).reshape(B, 1, 1, 1)
    ref = x * scale_ref
    assert jnp.allclose(out, ref, atol=1e-6, rtol=1e-6)

    # No-fold path (batch >= 8).
    x8 = jax.random.normal(k_x, (8, C, H, W), dtype=jnp.float32)
    out8 = jax.block_until_ready(module(x8, key=k_mask))
    u8 = jax.random.uniform(k_mask, (8,), dtype=jnp.float32)
    scale8 = (jnp.floor(jnp.float32(keep_prob) + u8)
              * jnp.float32(1.0 / keep_prob)).reshape(8, 1, 1, 1)
    assert jnp.allclose(out8, x8 * scale8, atol=1e-6, rtol=1e-6)

    # bf16 path: native-width multiply, scale quantized to bf16 (documented).
    x_bf = x.astype(jnp.bfloat16)
    out_bf = jax.block_until_ready(module(x_bf, key=k_mask))
    assert out_bf.dtype == jnp.bfloat16
    ref_bf = x_bf * scale_ref.astype(jnp.bfloat16)
    assert jnp.allclose(out_bf.astype(jnp.float32), ref_bf.astype(jnp.float32),
                        atol=1e-2, rtol=1e-2)

    # Eval mode / drop_prob=0 -> identity.
    module.training = False
    out_eval = jax.block_until_ready(module(x, key=k_mask))
    assert jnp.array_equal(out_eval, x)

    print("KERNEL_OK")
</pallas_src>

<mosaic_0001>
module attributes {stable_mosaic.version = 11 : i64} {
  func.func @_drop_path_kernel(%arg0: i32, %arg1: i32, %arg2: memref<8x1xf32, #tpu.memory_space<vmem>>, %arg3: memref<8x256xf32, #tpu.memory_space<vmem>>, %arg4: memref<8x256xf32, #tpu.memory_space<vmem>>) attributes {dimension_semantics = [#tpu.dimension_semantics<parallel>, #tpu.dimension_semantics<parallel>], iteration_bounds = array<i64: 1, 1>, scalar_prefetch = 0 : i64, scratch_operands = 0 : i64, tpu.core_type = #tpu.core_type<tc>, window_params = [{pipeline_mode = #tpu.pipeline_mode<synchronous>, transform_indices = @transform_0, window_bounds = array<i64: 8, 1>}, {transform_indices = @transform_1, window_bounds = array<i64: 8, 256>}, {transform_indices = @transform_2, window_bounds = array<i64: 8, 256>}]} {
    %c8_i32 = arith.constant 8 : i32
    %0 = arith.muli %arg0, %c8_i32 : i32
    %1 = arith.index_cast %0 : i32 to index
    %c0 = arith.constant 0 : index
    %2 = vector.load %arg2[%1, %c0] : memref<8x1xf32, #tpu.memory_space<vmem>>, vector<8x1xf32>
    %c0_0 = arith.constant 0 : index
    %c0_1 = arith.constant 0 : index
    %3 = vector.load %arg3[%c0_0, %c0_1] : memref<8x256xf32, #tpu.memory_space<vmem>>, vector<8x256xf32>
    %4 = vector.broadcast %2 : vector<8x1xf32> to vector<8x256xf32>
    %5 = arith.mulf %3, %4 : vector<8x256xf32>
    %c0_2 = arith.constant 0 : index
    %c0_3 = arith.constant 0 : index
    %6 = vector.load %arg4[%c0_2, %c0_3] : memref<8x256xf32, #tpu.memory_space<vmem>>, vector<8x256xf32>
    tpu.vector_store %arg4[%c0_2, %c0_3], %5 {strides = array<i32>} : memref<8x256xf32, #tpu.memory_space<vmem>>, vector<8x256xf32>,
    return
  }
  func.func @transform_0(%arg0: i32, %arg1: i32) -> (i32, i32) {
    %c0_i32 = arith.constant 0 : i32
    %c0_i32_0 = arith.constant 0 : i32
    %c0_i32_1 = arith.constant 0 : i32
    return %c0_i32, %c0_i32_0 : i32, i32
  }
  func.func @transform_1(%arg0: i32, %arg1: i32) -> (i32, i32) {
    %c0_i32 = arith.constant 0 : i32
    return %arg0, %arg1 : i32, i32
  }
  func.func @transform_2(%arg0: i32, %arg1: i32) -> (i32, i32) {
    %c0_i32 = arith.constant 0 : i32
    return %arg0, %arg1 : i32, i32
  }
}

</mosaic_0001>

<bundles_post_ra>
// kernel: tpu_custom_call.1
= control target key start
LH: loop header
LB: loop body
LE: loop exit
PB: predicated region body
PF: predicated region fallthrough
CT: control target
= control target key end

     0   :  { %7 = vsyncpa [#allocation3], 0  ;;  %s150_s0 = inlined_call_operand.vmem [shape: f32[8,1], index: 0, kind: input, shape index: {}]   ;;  %s151_s1 = inlined_call_operand.hbm [shape: f32[8,256], index: 1, kind: input, shape index: {}]   ;;  %s152_s2 = inlined_call_operand.hbm [shape: f32[8,256], index: 2, kind: output, shape index: {}]  }
   0x1   :  { %8 = vsyncpa [#allocation4], 0  ;;  %s105_s9 = smov [#allocation2]   ;;  %s57_s13 = scalar_lea.hbm %s151_s1, 256 }
   0x2   :  { %s17_s10 = sshll.u32 %s105_s9, 4  ;;  %p58_p0 = scmp.ne.s32.totalorder %s151_s1, %s57_s13  ;;  %s18_s10 = int_to_ptr.vmem [resolvable:$true] %s17_s10 }
   0x3   :  { %p61_p1 = scmp.lt.u32.totalorder %s57_s13, %s151_s1 }
   0x5   :  { %p63_p2 = pnand %p61_p1, %p58_p0 }
   0x7   :  { %66 = shalt.err (!%p63_p2)
}
   0x8   :  { %s67_s18 = scalar_lea.vmem %s18_s10, 256  ;;  %p72_p4 = scmp.lt.s32.totalorder %s18_s10, %s18_s10 }
   0x9   :  { %p68_p3 = scmp.ne.s32.totalorder %s18_s10, %s67_s18  ;;  %p73_p5 = scmp.lt.s32.totalorder %s67_s18, %s67_s18 }
   0xb   :  { %p74_p6 = por %p73_p5, %p72_p4 }
   0xd   :  { %p75_p7 = pnand %p74_p6, %p68_p3 }
   0xf   :  { %78 = shalt.err (!%p75_p7)
}
  0x10   :  { %20 = dma.hbm_to_vmem [thread:$0]  %s151_s1, 256, %s18_s10, [#allocation3]  }
  0x11   :  { %101 = dma.done.wait [#allocation3], 256  }
  0x12   :  { %102 = vsyncadd [#allocation3], 4294967040  ;;  %v106_v0 = vmov 0   ;;  %v26_v1 = vld [vmem:[%s150_s0] sm:$0xff]  ;;  %v28_v3 = vld [vmem:[#allocation2 + $0x8] sm:$0xff]  ;;  %s107_s23 = smov [#allocation5]  }
  0x13   :  { %56 = vset.pattern.permute.xlu0 %v106_v0  ;;  %v27_v2 = vld [vmem:[#allocation2] sm:$0xff]  ;;  %s44_s24 = sshll.u32 %s107_s23, 4  ;;  %s45_s24 = int_to_ptr.vmem [resolvable:$true] %s44_s24 }
  0x14   :  { %31 = vperm.xlu0 %56, %v26_v1   ;;  %s79_s1 = scalar_lea.vmem %s45_s24, 256  ;;  %p84_p9 = scmp.lt.s32.totalorder %s45_s24, %s45_s24 }
  0x15   :  { %p80_p8 = scmp.ne.s32.totalorder %s45_s24, %s79_s1  ;;  %p85_p10 = scmp.lt.s32.totalorder %s79_s1, %s79_s1 }
  0x17   :  { %p86_p11 = por %p85_p10, %p84_p9 }
  0x19   :  { %p87_p12 = pnand %p86_p11, %p80_p8 }
  0x93   :  { %v32_v4 = vpop.permute.xlu0 %31 }
  0x94   :  { %v34_v5 = vmul.f32 %v32_v4, %v27_v2  ;;  %v35_v6 = vmul.f32 %v32_v4, %v28_v3 }
  0x96   :  { %36 = vst [vmem:[#allocation5] sm:$0xff] %v34_v5  ;;  %37 = vst [vmem:[#allocation5 + $0x8] sm:$0xff] %v35_v6 }
  0x97   :  { %90 = shalt.err (!%p87_p12)
}
  0x98   :  { %s91_s26 = scalar_lea.hbm %s152_s2, 256 }
  0x99   :  { %p92_p13 = scmp.ne.s32.totalorder %s152_s2, %s91_s26  ;;  %p95_p0 = scmp.lt.u32.totalorder %s91_s26, %s152_s2 }
  0x9b   :  { %p97_p1 = pnand %p95_p0, %p92_p13 }
  0x9d   :  { %100 = shalt.err (!%p97_p1)
}
  0x9e   :  { %47 = dma.vmem_to_hbm [thread:$0]  %s45_s24, 256, %s152_s2, [#allocation4]  }
  0x9f   :  { %103 = dma.done.wait [#allocation4], 256  }
  0xa0   :  { %104 = vsyncadd [#allocation4], 4294967040 }
  0xa1   :  { %51 = vsyncpa [#allocation3], 1 }
  0xa2   :  { %52 = vsyncpa [#allocation4], 1 }

</bundles_post_ra>
